<compile_context>
chip_gen: v7x
topology: tpu7x:2x2x1
jax: 0.10.0
libtpu: 0.0.40
codegen_flags: <defaults>
</compile_context>

<pallas_src>
import math

import jax
import jax.numpy as jnp
from jax.experimental import pallas as pl
from jax.experimental.pallas import tpu as pltpu


# ----------------------------------------------------------------------------
# helpers
# ----------------------------------------------------------------------------
def _round_up(x, m):
    return ((x + m - 1) // m) * m


def _chip_config():
    """Per-generation (buffer budget, vmem_limit cap, tk cap, tn cap, tm)."""
    try:
        kind = jax.devices()[0].device_kind.lower()
    except Exception:
        kind = ""
    if "v2" in kind or "v3" in kind:          # tiny-VMEM generations
        return 10 * 2**20, 14 * 2**20, 512, 512, 256
    if "7" in kind:                            # v7x: 64 MiB VMEM per TensorCore
        return 28 * 2**20, 48 * 2**20, 1024, 1024, 512
    # v4 / v5e / v6e: 128 MiB VMEM
    return 64 * 2**20, 100 * 2**20, 2048, 2048, 512


# ----------------------------------------------------------------------------
# kernels
# ----------------------------------------------------------------------------
def _gcn_kernel_single(adj_ref, x_ref, w_ref, bias_ref, o_ref):
    """Whole contraction (node) axis in one block: no accumulator plumbing.

    x and the W column strip are VMEM-resident; adj arrives in its native
    dtype and is cast per-tile.  Both matmuls accumulate in f32 on the MXU,
    the bias is added in f32, one store per output tile.
    """
    cd = x_ref.dtype
    sup = jnp.dot(x_ref[...], w_ref[...], preferred_element_type=jnp.float32)
    out = jnp.dot(adj_ref[...].astype(cd), sup.astype(cd),
                  preferred_element_type=jnp.float32)
    o_ref[...] = (out + bias_ref[...].astype(jnp.float32)).astype(o_ref.dtype)


def _gcn_kernel_acc(adj_ref, x_ref, w_ref, bias_ref, o_ref, acc_ref, sup_ref):
    """General path, grid = (j, i, k) with j outermost.

    The support strip S_j = x @ W[:, j] is computed once per j (at i == 0,
    block-k by block-k) into the persistent VMEM scratch `sup_ref` and reused
    for every adj row tile i -> no per-i MXU recompute and no HBM round-trip.
    The f32 accumulator is seeded with the broadcast bias at k == 0.
    """
    i = pl.program_id(1)
    k = pl.program_id(2)
    tk = adj_ref.shape[1]
    cd = sup_ref.dtype
    row0 = pl.multiple_of(k * tk, tk)

    @pl.when(i == 0)
    def _():
        sup_ref[pl.ds(row0, tk), :] = jnp.dot(
            x_ref[pl.ds(row0, tk), :], w_ref[...],
            preferred_element_type=jnp.float32).astype(cd)

    @pl.when(k == 0)
    def _():
        acc_ref[...] = jnp.broadcast_to(bias_ref[...].astype(jnp.float32),
                                        acc_ref.shape)

    acc_ref[...] += jnp.dot(adj_ref[...].astype(cd),
                            sup_ref[pl.ds(row0, tk), :],
                            preferred_element_type=jnp.float32)

    @pl.when(k == pl.num_programs(2) - 1)
    def _():
        o_ref[...] = acc_ref[...].astype(o_ref.dtype)


# ----------------------------------------------------------------------------
# wrapper
# ----------------------------------------------------------------------------
def graph_convolution(x, adj, weight, bias=None, *,
                      compute_dtype=jnp.bfloat16, out_dtype=None,
                      tm=None, tn=None, tk=None):
    """GraphConvolution.forward: adj @ (x @ weight) + bias, fused on-chip.

    x:      [N, F_in]   dense node features
    adj:    [N, N]      dense (row-normalized) adjacency, streamed in its
                        native dtype (cast to compute_dtype per-tile in-kernel)
    weight: [F_in, F_out]
    bias:   [F_out] or None
    compute_dtype: MXU operand dtype (default bf16; accumulation is always f32
                   and the bias is added in f32).  Pass jnp.float32 for
                   f32-faithful numerics.
    """
    N, F_in = x.shape
    assert weight.shape[0] == F_in
    F_out = weight.shape[1]
    assert adj.shape == (N, N)

    out_dtype = out_dtype if out_dtype is not None else x.dtype
    cd = jnp.dtype(compute_dtype if compute_dtype is not None else x.dtype)

    adj_b = jnp.dtype(adj.dtype).itemsize
    cd_b = cd.itemsize
    out_b = jnp.dtype(out_dtype).itemsize

    Fin_pad = _round_up(F_in, 128)      # lane-align the small matmul contraction
    Fo_full = _round_up(F_out, 128)

    budget, vmem_cap, tk_cap, tn_cap, tm_dflt = _chip_config()

    # ---- tile selection -----------------------------------------------------
    # tn: whole padded F_out in one column tile when it fits (num_j == 1 ->
    #     adj streamed exactly once).  tk/tm: as large as the per-chip VMEM
    #     buffer budget allows (fewer grid steps, better DMA efficiency).
    tm_ = tm if tm is not None else min(tm_dflt, _round_up(N, 8))
    tn_ = tn if tn is not None else min(tn_cap, Fo_full)
    tk_ = tk if tk is not None else min(tk_cap, _round_up(N, 128))

    def _est(tm_v, tn_v, tk_v):
        nk = _round_up(N, tk_v)
        return (2 * tm_v * tk_v * adj_b        # adj tile, double-buffered, native dtype
                + 2 * nk * Fin_pad * cd_b      # x resident (counted x2 conservatively)
                + nk * tn_v * cd_b             # support strip scratch
                + 2 * Fin_pad * tn_v * cd_b    # W column strip
                + 2 * tn_v * 4                 # bias
                + 2 * tm_v * tn_v * out_b      # out tile, double-buffered
                + tm_v * tn_v * 4)             # f32 accumulator

    if tm is None and tn is None and tk is None:
        # Shrink tk first (no extra HBM traffic), then tm, then tn (tn last:
        # shrinking it multiplies the adj re-stream by num_j).
        while _est(tm_, tn_, tk_) > budget:
            if tk_ > 128:
                tk_ = _round_up(tk_ // 2, 128)
            elif tm_ > 128:
                tm_ = _round_up(tm_ // 2, 8)
            elif tn_ > 128:
                tn_ = _round_up(tn_ // 2, 128)
            elif tm_ > 8:
                tm_ = _round_up(tm_ // 2, 8)
            else:
                break

    single_k = _round_up(N, 128) <= tk_

    if single_k:
        Nk = _round_up(N, 128)
        Nm = _round_up(N, tm_)
        Fo = _round_up(F_out, tn_)
        num_i, num_j = Nm // tm_, Fo // tn_
        # v7x megacore occupancy: avoid a (1, 1) grid on small graphs so both
        # TensorCores get a row tile (extra step costs ~0.35 us elsewhere).
        if num_i == 1 and num_j == 1 and N >= 16:
            tm_ = _round_up((N + 1) // 2, 8)
            Nm = 2 * tm_
            num_i = 2
    else:
        Nk = _round_up(N, tk_)
        Nm = _round_up(N, tm_)
        Fo = _round_up(F_out, tn_)
        num_i, num_j, num_k = Nm // tm_, Fo // tn_, Nk // tk_

    # ---- operand prep (x/W are small; adj stays in native dtype) -----------
    x_c = x.astype(cd)
    w_c = weight.astype(cd)
    if Fin_pad != F_in:
        x_c = jnp.pad(x_c, ((0, 0), (0, Fin_pad - F_in)))
        w_c = jnp.pad(w_c, ((0, Fin_pad - F_in), (0, 0)))
    if Nk != N:
        x_c = jnp.pad(x_c, ((0, Nk - N), (0, 0)))

    bias_f = (jnp.zeros((F_out,), jnp.float32) if bias is None
              else bias.astype(jnp.float32))
    if Fo != F_out:
        w_c = jnp.pad(w_c, ((0, 0), (0, Fo - F_out)))
        bias_f = jnp.pad(bias_f, (0, Fo - F_out))
    bias2 = bias_f.reshape(1, Fo)

    adj_c = adj                       # no wrapper-side cast (extra N^2 pass)
    if Nm != N or Nk != N:
        adj_c = jnp.pad(adj_c, ((0, Nm - N), (0, Nk - N)))

    # ---- explicit scoped-VMEM limit -----------------------------------------
    est = _est(tm_, tn_, Nk if single_k else tk_)
    vmem_limit = int(min(vmem_cap, max(16 * 2**20, est + est // 2)))

    if single_k:
        out = pl.pallas_call(
            _gcn_kernel_single,
            out_shape=jax.ShapeDtypeStruct((Nm, Fo), out_dtype),
            grid_spec=pltpu.PrefetchScalarGridSpec(
                num_scalar_prefetch=0,
                grid=(num_i, num_j),
                in_specs=[
                    pl.BlockSpec((tm_, Nk), lambda i, j: (i, 0)),       # adj rows
                    pl.BlockSpec((Nk, Fin_pad), lambda i, j: (0, 0)),   # x resident
                    pl.BlockSpec((Fin_pad, tn_), lambda i, j: (0, j)),  # W strip
                    pl.BlockSpec((1, tn_), lambda i, j: (0, j)),        # bias
                ],
                out_specs=pl.BlockSpec((tm_, tn_), lambda i, j: (i, j)),
            ),
            compiler_params=pltpu.CompilerParams(
                dimension_semantics=("parallel", "parallel"),
                vmem_limit_bytes=vmem_limit),
        )(adj_c, x_c, w_c, bias2)
    else:
        # grid = (j, i, k): j outermost so the support strip is built once per
        # output-column tile and reused across every adj row tile.
        out = pl.pallas_call(
            _gcn_kernel_acc,
            out_shape=jax.ShapeDtypeStruct((Nm, Fo), out_dtype),
            grid_spec=pltpu.PrefetchScalarGridSpec(
                num_scalar_prefetch=0,
                grid=(num_j, num_i, num_k),
                in_specs=[
                    pl.BlockSpec((tm_, tk_), lambda j, i, k: (i, k)),      # adj tile
                    pl.BlockSpec((Nk, Fin_pad), lambda j, i, k: (0, 0)),   # x resident
                    pl.BlockSpec((Fin_pad, tn_), lambda j, i, k: (0, j)),  # W strip
                    pl.BlockSpec((1, tn_), lambda j, i, k: (0, j)),        # bias
                ],
                out_specs=pl.BlockSpec((tm_, tn_), lambda j, i, k: (i, j)),
                scratch_shapes=[pltpu.VMEM((tm_, tn_), jnp.float32),   # f32 acc
                                pltpu.VMEM((Nk, tn_), cd)],            # support strip
            ),
            compiler_params=pltpu.CompilerParams(
                dimension_semantics=("parallel", "arbitrary", "arbitrary"),
                vmem_limit_bytes=vmem_limit),
        )(adj_c, x_c, w_c, bias2)

    if Nm != N or Fo != F_out:
        out = out[:N, :F_out]
    return out


# ----------------------------------------------------------------------------
# parameter init (matches reset_parameters(): uniform(-stdv, stdv))
# ----------------------------------------------------------------------------
def init_graph_conv_params(key, in_features, out_features, dtype=jnp.float32):
    stdv = 1.0 / math.sqrt(out_features)
    kw, kb = jax.random.split(key)
    weight = jax.random.uniform(kw, (in_features, out_features), dtype,
                                minval=-stdv, maxval=stdv)
    bias = jax.random.uniform(kb, (out_features,), dtype,
                              minval=-stdv, maxval=stdv)
    return weight, bias


# ----------------------------------------------------------------------------
# demo / self-check
# ----------------------------------------------------------------------------
if __name__ == "__main__":
    key = jax.random.PRNGKey(0)
    k_x, k_adj, k_param, k_x2, k_adj2, k_param2 = jax.random.split(key, 6)

    # --- case 1: tile-aligned shapes (exercises the fused single-k path) ----
    n_nodes, in_features, out_features = 128, 64, 128

    x = jax.random.normal(k_x, (n_nodes, in_features), jnp.float32)
    adj_raw = jax.random.uniform(k_adj, (n_nodes, n_nodes), jnp.float32)
    adj_raw = (adj_raw > 0.7).astype(jnp.float32) + jnp.eye(n_nodes,
                                                            dtype=jnp.float32)
    adj = adj_raw / jnp.sum(adj_raw, axis=-1, keepdims=True)
    weight, bias = init_graph_conv_params(k_param, in_features, out_features)

    ref = adj @ (x @ weight) + bias[None, :]

    # exact-ish path: f32 operands (matches the PyTorch module numerics)
    out_f32 = jax.block_until_ready(
        graph_convolution(x, adj, weight, bias, compute_dtype=jnp.float32))
    assert out_f32.shape == (n_nodes, out_features)
    assert jnp.allclose(out_f32, ref, atol=2e-3, rtol=2e-3), "f32 mismatch"

    # recommended fast path: bf16 operands, f32 accumulation, f32 bias add
    out_bf16 = jax.block_until_ready(graph_convolution(x, adj, weight, bias))
    assert jnp.allclose(out_bf16.astype(jnp.float32), ref,
                        atol=5e-2, rtol=5e-2), "bf16 mismatch"

    # --- case 2: non-aligned shapes, forced multi-k (accumulator path) ------
    n2, fi2, fo2 = 200, 48, 100
    x2 = jax.random.normal(k_x2, (n2, fi2), jnp.float32)
    adj2_raw = jax.random.uniform(k_adj2, (n2, n2), jnp.float32)
    adj2_raw = (adj2_raw > 0.7).astype(jnp.float32) + jnp.eye(n2,
                                                              dtype=jnp.float32)
    adj2 = adj2_raw / jnp.sum(adj2_raw, axis=-1, keepdims=True)
    w2, b2 = init_graph_conv_params(k_param2, fi2, fo2)

    ref2 = adj2 @ (x2 @ w2) + b2[None, :]
    out2 = jax.block_until_ready(
        graph_convolution(x2, adj2, w2, b2, compute_dtype=jnp.float32,
                          tm=128, tk=128))    # forces num_k > 1 + padding
    assert out2.shape == (n2, fo2)
    assert jnp.allclose(out2, ref2, atol=2e-3, rtol=2e-3), "multi-k mismatch"

    print("KERNEL_OK")
</pallas_src>

<mosaic_0001>
module attributes {stable_mosaic.version = 11 : i64} {
  func.func @_gcn_kernel_single(%arg0: i32, %arg1: i32, %arg2: memref<64x128xf32, #tpu.memory_space<vmem>>, %arg3: memref<128x128xf32, #tpu.memory_space<vmem>>, %arg4: memref<128x128xf32, #tpu.memory_space<vmem>>, %arg5: memref<1x128xf32, #tpu.memory_space<vmem>>, %arg6: memref<64x128xf32, #tpu.memory_space<vmem>>) attributes {dimension_semantics = [#tpu.dimension_semantics<parallel>, #tpu.dimension_semantics<parallel>], iteration_bounds = array<i64: 2, 1>, scalar_prefetch = 0 : i64, scratch_operands = 0 : i64, tpu.core_type = #tpu.core_type<tc>, window_params = [{transform_indices = @transform_0, window_bounds = array<i64: 64, 128>}, {pipeline_mode = #tpu.pipeline_mode<synchronous>, transform_indices = @transform_1, window_bounds = array<i64: 128, 128>}, {transform_indices = @transform_2, window_bounds = array<i64: 128, 128>}, {transform_indices = @transform_3, window_bounds = array<i64: 1, 128>}, {transform_indices = @transform_4, window_bounds = array<i64: 64, 128>}]} {
    %c0 = arith.constant 0 : index
    %c0_0 = arith.constant 0 : index
    %0 = vector.load %arg3[%c0, %c0_0] : memref<128x128xf32, #tpu.memory_space<vmem>>, vector<128x128xf32>
    %c0_1 = arith.constant 0 : index
    %c0_2 = arith.constant 0 : index
    %1 = vector.load %arg4[%c0_1, %c0_2] : memref<128x128xf32, #tpu.memory_space<vmem>>, vector<128x128xf32>
    %cst = arith.constant dense<0.000000e+00> : vector<128x128xf32>
    %2 = tpu.matmul %0, %1, %cst {dimension_numbers = #tpu.dot_dimension_numbers<[1], [0], [0], [1], [0, 0, 1, 1], [], []>} : vector<128x128xf32>, vector<128x128xf32>, vector<128x128xf32> -> vector<128x128xf32>
    %c0_3 = arith.constant 0 : index
    %c0_4 = arith.constant 0 : index
    %3 = vector.load %arg2[%c0_3, %c0_4] : memref<64x128xf32, #tpu.memory_space<vmem>>, vector<64x128xf32>
    %cst_5 = arith.constant dense<0.000000e+00> : vector<64x128xf32>
    %4 = tpu.matmul %3, %2, %cst_5 {dimension_numbers = #tpu.dot_dimension_numbers<[1], [0], [0], [1], [0, 0, 1, 1], [], []>} : vector<64x128xf32>, vector<128x128xf32>, vector<64x128xf32> -> vector<64x128xf32>
    %c0_6 = arith.constant 0 : index
    %c0_7 = arith.constant 0 : index
    %5 = vector.load %arg5[%c0_6, %c0_7] : memref<1x128xf32, #tpu.memory_space<vmem>>, vector<1x128xf32>
    %6 = vector.broadcast %5 : vector<1x128xf32> to vector<64x128xf32>
    %7 = arith.addf %4, %6 : vector<64x128xf32>
    %c0_8 = arith.constant 0 : index
    %c0_9 = arith.constant 0 : index
    %8 = vector.load %arg6[%c0_8, %c0_9] : memref<64x128xf32, #tpu.memory_space<vmem>>, vector<64x128xf32>
    tpu.vector_store %arg6[%c0_8, %c0_9], %7 {strides = array<i32>} : memref<64x128xf32, #tpu.memory_space<vmem>>, vector<64x128xf32>,
    return
  }
  func.func @transform_0(%arg0: i32, %arg1: i32) -> (i32, i32) {
    %c0_i32 = arith.constant 0 : i32
    %c0_i32_0 = arith.constant 0 : i32
    return %arg0, %c0_i32 : i32, i32
  }
  func.func @transform_1(%arg0: i32, %arg1: i32) -> (i32, i32) {
    %c0_i32 = arith.constant 0 : i32
    %c0_i32_0 = arith.constant 0 : i32
    %c0_i32_1 = arith.constant 0 : i32
    return %c0_i32, %c0_i32_0 : i32, i32
  }
  func.func @transform_2(%arg0: i32, %arg1: i32) -> (i32, i32) {
    %c0_i32 = arith.constant 0 : i32
    %c0_i32_0 = arith.constant 0 : i32
    return %c0_i32, %arg1 : i32, i32
  }
  func.func @transform_3(%arg0: i32, %arg1: i32) -> (i32, i32) {
    %c0_i32 = arith.constant 0 : i32
    %c0_i32_0 = arith.constant 0 : i32
    return %c0_i32, %arg1 : i32, i32
  }
  func.func @transform_4(%arg0: i32, %arg1: i32) -> (i32, i32) {
    %c0_i32 = arith.constant 0 : i32
    return %arg0, %arg1 : i32, i32
  }
}

</mosaic_0001>

<bundles_post_ra>
// kernel: tpu_custom_call.1
= control target key start
LH: loop header
LB: loop body
LE: loop exit
PB: predicated region body
PF: predicated region fallthrough
CT: control target
= control target key end

     0   :  { %9 = vsyncpa [#allocation3], 0  ;;  %s1536_s0 = inlined_call_operand.hbm [shape: f32[128,128], index: 0, kind: input, shape index: {}]   ;;  %s1537_s1 = inlined_call_operand.hbm [shape: f32[128,128], index: 1, kind: input, shape index: {}]   ;;  %s1538_s2 = inlined_call_operand.hbm [shape: f32[128,128], index: 2, kind: input, shape index: {}]   ;;  %s1539_s3 = inlined_call_operand.vmem [shape: f32[1,128], index: 3, kind: input, shape index: {}]   ;;  %s1540_s4 = inlined_call_operand.hbm [shape: f32[128,128], index: 4, kind: output, shape index: {}]  }
   0x1   :  { %11 = vsyncpa [#allocation3 + $0x1], 0 }
   0x2   :  { %12 = vsyncpa [#allocation6], 0 }
   0x3   :  { %13 = vsyncpa [#allocation4], 0 }
   0x4   :  { %15 = vsyncpa [#allocation4 + $0x1], 0  ;;  %s1255_s15 = smov 0   ;;  %s1257_s16 = smov 0  }
   0x5   :  { %s1259_s17 = smov 0   ;;  %s1261_s18 = smov 0  }
   0x6   :  { %s1263_s19 = smov 0   ;;  %s1265_s20 = smov 0  }
   0x7 LB: > { %s718_s21 = sadd.s32 4294967295, %s1220_s20   ;;  %s719_s22 = sadd.s32 4294967294, %s1220_s20   ;;  %s1220_s20 = sphi %s1265_s20, %s21_s20   ;;  %s1216_s19 = sphi %s1263_s19, %s1562_s19   ;;  %s1212_s18 = sphi %s1261_s18, %s1561_s18   ;;  %s1208_s17 = sphi %s1259_s17, %s1560_s17   ;;  %s1204_s16 = sphi %s1257_s16, %s1559_s16   ;;  %s1200_s15 = sphi %s1255_s15, %s1558_s15  }
   0x8   : > { %p53_p0 = scmp.ne.s32.totalorder %s1204_s16, %s1200_s15  ;;  %p1289_p1 = scmp.eq.s32.totalorder %s718_s21, 0 }
   0x9   : > { %p1293_p2 = scmp.eq.s32.totalorder %s718_s21, 1  ;;  %p158_p3 = scmp.eq.s32.totalorder %s719_s22, 1 }
   0xa   : > { %s1545_s23 = scalar_select %p1289_p1, 1, 0 }
   0xb   : > { %p1299_p4 = por %p1289_p1, %p53_p0  ;;  %p720_p5 = scmp.ge.s32.totalorder %s1220_s20, 1 }
   0xc   : > { %p1304_p6 = por %p158_p3, %p53_p0  ;;  %p165_p7 = scmp.lt.s32.totalorder %s1220_s20, 3 }
   0xd   : > { %s1547_s25 = scalar_select %p1299_p4, 1, 0 }
   0xe   : > { %s1548_s26 = scalar_select %p1304_p6, 1, 0 }
   0xf   : > { %p1309_p8 = pnand %p720_p5, %p165_p7  ;;  %s1222_s28 = smov [#allocation5]  }
  0x10   : > { %s177_s29 = sshll.u32 %s1222_s28, 4  ;;  %s1223_s5 = smov [#allocation7]   ;;  %s1313_s29 = int_to_ptr.vmem [resolvable:$true] %s177_s29 }
  0x11   : > { %p973_p9 = pneg %p1309_p8  ;;  %s192_s6 = sshll.u32 %s1223_s5, 4  ;;  %s1324_s6 = int_to_ptr.vmem [resolvable:$true] %s192_s6 }
  0x12   : > { %s1048_s9 = scalar_lea.hbm %s1537_s1, 2048 }
  0x13   : > { %p1320_p11 = pnand %p973_p9, %p1289_p1  ;;  %p1049_p12 = scmp.ne.s32.totalorder %s1537_s1, %s1048_s9 }
  0x14   : > { %p1055_p5 = scmp.lt.u32.totalorder %s1048_s9, %s1537_s1 }
  0x15   : > { %p1050_p13 = pneg %p1320_p11 }
  0x17   : > { %p1051_p0 = pnand %p1050_p13, %p1049_p12 }
  0x19   : > { %p1052_p3 = pneg %p1051_p0 }
  0x1b   : > { %p1057_p7 = pnand %p1055_p5, %p1052_p3 }
  0x1d   : > { %1060 = shalt.err (!%p1057_p7)
}
  0x1e   : > { %s1061_s14 = scalar_lea.vmem %s1313_s29, 2048  ;;  %p1069_p1 = scmp.lt.s32.totalorder %s1313_s29, %s1313_s29 }
  0x1f   : > { %p1062_p9 = scmp.ne.s32.totalorder %s1313_s29, %s1061_s14  ;;  %p1070_p12 = scmp.lt.s32.totalorder %s1061_s14, %s1061_s14 }
  0x21   : > { %p1064_p10 = pnand %p1062_p9, %p1050_p13  ;;  %p1071_p0 = por %p1070_p12, %p1069_p1 }
  0x23   : > { %p1065_p6 = pneg %p1064_p10 }
  0x25   : > { %p1072_p4 = pnand %p1071_p0, %p1065_p6 }
  0x27   : > { %1075 = shalt.err (!%p1072_p4)
}
  0x28   : > { %s1224_s21 = smov 128   ;;  %s1225_s22 = smov 8  }
  0x29   : > { %976 = dma.hbm_to_vmem [thread:$0]  (!%p1320_p11), %s1537_s1, 2048, %s1313_s29, [#allocation6], %s1224_s21, %s1224_s21, %s1225_s22  }
  0x2a   : > { %s1076_s9 = scalar_lea.hbm %s1538_s2, 2048 }
  0x2b   : > { %p1077_p1 = scmp.ne.s32.totalorder %s1538_s2, %s1076_s9  ;;  %p1083_p10 = scmp.lt.u32.totalorder %s1076_s9, %s1538_s2 }
  0x2d   : > { %p1079_p4 = pnand %p1077_p1, %p1050_p13 }
  0x2f   : > { %p1080_p6 = pneg %p1079_p4 }
  0x31   : > { %p1085_p3 = pnand %p1083_p10, %p1080_p6 }
  0x33   : > { %1088 = shalt.err (!%p1085_p3)
}
  0x34   : > { %s1089_s29 = scalar_lea.vmem %s1324_s6, 2048  ;;  %p1097_p12 = scmp.lt.s32.totalorder %s1324_s6, %s1324_s6 }
  0x35   : > { %p1090_p5 = scmp.ne.s32.totalorder %s1324_s6, %s1089_s29  ;;  %p1098_p0 = scmp.lt.s32.totalorder %s1089_s29, %s1089_s29 }
  0x37   : > { %p1092_p7 = pnand %p1090_p5, %p1050_p13  ;;  %p1099_p1 = por %p1098_p0, %p1097_p12 }
  0x39   : > { %p1093_p9 = pneg %p1092_p7 }
  0x3b   : > { %p1100_p4 = pnand %p1099_p1, %p1093_p9 }
  0x3d   : > { %1103 = shalt.err (!%p1100_p4)
}
  0x3e   : > { %979 = dma.hbm_to_vmem [thread:$0]  (!%p1320_p11), %s1538_s2, 2048, %s1324_s6, [#allocation6], %s1224_s21, %s1224_s21, %s1225_s22  }
  0x3f   : > { %s33_s30 = sadd.s32 1, %s1216_s19  ;;  %s40_s5 = sadd.s32 1, %s1208_s17 }
  0x40   : > { %p35_p13 = scmp.ge.s32.totalorder %s33_s30, 2  ;;  %p47_p6 = scmp.ne.s32.totalorder %s1208_s17, %s1204_s16 }
  0x41   : > { %p48_p10 = scmp.eq.s32.totalorder %s1220_s20, 0  ;;  %p990_p3 = scmp.lt.s32.totalorder %s1220_s20, 2 }
  0x42   : > { %s1564_s30 = smov (%p35_p13, %s33_s30), 0  ;;  %p1394_p7 = por %p1293_p2, %p47_p6 }
  0x43   : > { %p49_p5 = por %p48_p10, %p47_p6  ;;  %s37_s8 = ssub.s32 %s1216_s19, %s1564_s30 }
  0x44   : > { %s1551_s7 = scalar_select %p1394_p7, 1, 0 }
  0x45   : > { %s212_s9 = sand.u32 1, %s1208_s17   ;;  %p38_p9 = scmp.eq.s32.totalorder %s37_s8, 0 }
  0x46   : > { %s725_s6 = sshll.u32 %s212_s9, 6  ;;  %s739_s10 = sshll.u32 %s1216_s19, 10 }
  0x47   : > { %s1403_s11 = scalar_select %p38_p9, %s1208_s17, %s40_s5  }
  0x48   : > { %s1408_s29 = scalar_lea.hbm %s1536_s0, %s739_s10  ;;  %s216_s24 = scalar_lea.vmem [#allocation2], %s725_s6 }
  0x49   : > { %s223_s14 = sshll.u32 %s216_s24, 4  ;;  %p1412_p2 = pnand %p990_p3, %p49_p5  ;;  %s1416_s14 = int_to_ptr.vmem [resolvable:$true] %s223_s14 }
  0x4a   : > { %s1418_s5 = scalar_lea.sflag [#allocation3], %s212_s9  ;;  %s1104_s8 = scalar_lea.hbm %s1408_s29, 1024 }
  0x4b   : > { %p1105_p11 = scmp.ne.s32.totalorder %s1408_s29, %s1104_s8  ;;  %p1106_p12 = pneg %p1412_p2 }
  0x4c   : > { %s1109_s12 = scalar_lea.hbm %s1536_s0, 2048  ;;  %p1110_p4 = scmp.lt.u32.totalorder %s1408_s29, %s1536_s0 }
  0x4d   : > { %p1107_p0 = pnand %p1106_p12, %p1105_p11  ;;  %p1111_p13 = scmp.lt.u32.totalorder %s1109_s12, %s1104_s8 }
  0x4e   : > { %p1113_p10 = scmp.lt.u32.totalorder %s1104_s8, %s1408_s29 }
  0x4f   : > { %p1108_p1 = pneg %p1107_p0  ;;  %p1112_p6 = por %p1111_p13, %p1110_p4 }
  0x51   : > { %p1114_p3 = por %p1113_p10, %p1112_p6 }
  0x53   : > { %p1115_p5 = pnand %p1114_p3, %p1108_p1 }
  0x55   : > { %1118 = shalt.err (!%p1115_p5)
}
  0x56   : > { %s1119_s9 = scalar_lea.vmem %s1416_s14, 1024  ;;  %s1226_s6 = smov [#allocation2]  }
  0x57   : > { %p1120_p9 = scmp.ne.s32.totalorder %s1416_s14, %s1119_s9  ;;  %s1124_s10 = sshll.u32 %s1226_s6, 4  ;;  %s1125_s10 = int_to_ptr.vmem [resolvable:$false] %s1124_s10 }
  0x58   : > { %s1126_s13 = scalar_lea.vmem %s1125_s10, 2048  ;;  %p1127_p7 = scmp.lt.s32.totalorder %s1416_s14, %s1125_s10 }
  0x59   : > { %p1122_p11 = pnand %p1120_p9, %p1106_p12  ;;  %p1128_p4 = scmp.lt.s32.totalorder %s1126_s13, %s1119_s9 }
  0x5b   : > { %p1123_p0 = pneg %p1122_p11  ;;  %p1129_p13 = por %p1128_p4, %p1127_p7 }
  0x5d   : > { %p1130_p6 = pnand %p1129_p13, %p1123_p0 }
  0x5f   : > { %1133 = shalt.err (!%p1130_p6)
}
  0x60   : > { %983 = dma.hbm_to_vmem [thread:$0]  (!%p1412_p2), %s1408_s29, 1024, %s1416_s14, %s1418_s5, %s1224_s21, %s1224_s21, %s1225_s22  }
  0x61   : > { %235 = sbr.rel (%p1309_p8) target bundleno = 632 (0x278), region = 36  ;;  %s1452_s8 = sand.u32 (!%p1309_p8), 1, %s1204_s16  }
  0x62   : > { %s729_s12 = sshll.u32 (!%p1309_p8), %s1452_s8, 6  ;;  %s238_s24 = scalar_lea.sflag (!%p1309_p8), [#allocation3], %s1452_s8 }
  0x63   : > { %s1458_s28 = scalar_lea.vmem (!%p1309_p8), [#allocation2], %s729_s12  ;;  %p1553_p7 = scmp.ne.s32.totalorder (!%p1309_p8), %s1547_s25, 0 }
  0x68   : > { %1187 = dma.done.wait (%p1553_p7), %s238_s24, 1024  }
  0x69   : > { %1189 = vsyncadd (%p1553_p7), %s238_s24, 4294966272  ;;  %p1554_p2 = scmp.ne.s32.totalorder %s1545_s23, 0 }
  0x6b   : > { %1191 = dma.done.wait (%p1554_p2), [#allocation6], 4096  }
  0x6c   : > { %1193 = vsyncadd (%p1554_p2), [#allocation6], 4294963200  ;;  %v298_v0 = vld [vmem:[#allocation7] sm:$0xff]  ;;  %v299_v1 = vld [vmem:[#allocation7 + $0x8] sm:$0xff]  ;;  %s276_s27 = scalar_lea.vmem [#allocation8], %s729_s12  ;;  %s740_s22 = sshll.u32 %s1212_s18, 10 }
  0x6d   : > { %v300_v2 = vld [vmem:[#allocation7 + $0x10] sm:$0xff]  ;;  %v897_v3 = vpack.c.bf16 %v299_v1, %v298_v0  ;;  %v301_v4 = vld [vmem:[#allocation7 + $0x18] sm:$0xff]  ;;  %v302_v6 = vld [vmem:[#allocation7 + $0x20] sm:$0xff]  ;;  %s602_s21 = sshll.u32 %s276_s27, 4  ;;  %s1487_s5 = scalar_lea.hbm %s1540_s4, %s740_s22  ;;  %s1482_s21 = int_to_ptr.vmem [resolvable:$true] %s602_s21 }
  0x6e   : > { %v901_v5 = vpack.c.bf16 %v301_v4, %v300_v2  ;;  %v303_v7 = vld [vmem:[#allocation7 + $0x28] sm:$0xff]  ;;  %v282_v9 = vld [vmem:[#allocation5] sm:$0xff]  ;;  %v304_v10 = vld [vmem:[#allocation7 + $0x30] sm:$0xff]  ;;  %s588_s9 = scalar_lea.sflag [#allocation4], %s1452_s8  ;;  %s1134_s18 = scalar_lea.vmem %s1482_s21, 1024 }
  0x6f   : > { %898 = vmatprep.subr.bf16.mxu0 %v897_v3  ;;  %v905_v8 = vpack.c.bf16 %v303_v7, %v302_v6  ;;  %v305_v11 = vld [vmem:[#allocation7 + $0x38] sm:$0xff]  ;;  %829 = vmatprep.mubr.f32.mxu0 %v282_v9  ;;  %v306_v13 = vld [vmem:[#allocation7 + $0x40] sm:$0xff]  ;;  %v307_v14 = vld [vmem:[#allocation7 + $0x48] sm:$0xff]  ;;  %p1135_p8 = scmp.ne.s32.totalorder %s1482_s21, %s1134_s18  ;;  %p1555_p12 = scmp.ne.s32.totalorder %s1551_s7, 0 }
  0x70   : > { %900 = vmatpush3.bf16.msra.mxu0 %v897_v3  ;;  %v909_v12 = vpack.c.bf16 %v305_v11, %v304_v10  ;;  %v913_v15 = vpack.c.bf16 %v307_v14, %v306_v13  ;;  %v308_v16 = vld [vmem:[#allocation7 + $0x50] sm:$0xff]  ;;  %v309_v17 = vld [vmem:[#allocation7 + $0x58] sm:$0xff]  ;;  %v310_v19 = vld [vmem:[#allocation7 + $0x60] sm:$0xff]  ;;  %s1227_s6 = smov [#allocation8]  }
  0x71   : > { %902 = vmatprep.subr.bf16.mxu0 %v901_v5  ;;  %v917_v18 = vpack.c.bf16 %v309_v17, %v308_v16  ;;  %v311_v20 = vld [vmem:[#allocation7 + $0x68] sm:$0xff]  ;;  %v312_v22 = vld [vmem:[#allocation7 + $0x70] sm:$0xff]  ;;  %v313_v23 = vld [vmem:[#allocation7 + $0x78] sm:$0xff]  ;;  %p1136_p1 = pnand %p1135_p8, %p1555_p12  ;;  %s1138_s10 = sshll.u32 %s1227_s6, 4  ;;  %s1139_s10 = int_to_ptr.vmem [resolvable:$false] %s1138_s10 }
  0x72   : > { %v921_v21 = vpack.c.bf16 %v311_v20, %v310_v19  ;;  %v925_v24 = vpack.c.bf16 %v313_v23, %v312_v22  ;;  %v283_v25 = vld [vmem:[#allocation5 + $0x8] sm:$0xff]  ;;  %v284_v26 = vld [vmem:[#allocation5 + $0x10] sm:$0xff]  ;;  %v285_v27 = vld [vmem:[#allocation5 + $0x18] sm:$0xff]  ;;  %s1140_s13 = scalar_lea.vmem %s1139_s10, 2048  ;;  %p1141_p3 = scmp.lt.s32.totalorder %s1482_s21, %s1139_s10 }
  0x73   : > { %v286_v28 = vld [vmem:[#allocation5 + $0x20] sm:$0xff]  ;;  %v287_v29 = vld [vmem:[#allocation5 + $0x28] sm:$0xff]  ;;  %v288_v30 = vld [vmem:[#allocation5 + $0x30] sm:$0xff]  ;;  %p1137_p10 = pneg %p1136_p1  ;;  %p1142_p5 = scmp.lt.s32.totalorder %s1140_s13, %s1134_s18 }
  0x74   : > { %904 = vmatpush3.bf16.msra.mxu0 %v901_v5  ;;  %v289_v31 = vld [vmem:[#allocation5 + $0x38] sm:$0xff]  ;;  %v290_v32 = vld [vmem:[#allocation5 + $0x40] sm:$0xff]  ;;  %v291_v33 = vld [vmem:[#allocation5 + $0x48] sm:$0xff] }
  0x75   : > { %906 = vmatprep.subr.bf16.mxu0 %v905_v8  ;;  %v292_v34 = vld [vmem:[#allocation5 + $0x50] sm:$0xff]  ;;  %v293_v35 = vld [vmem:[#allocation5 + $0x58] sm:$0xff]  ;;  %v294_v36 = vld [vmem:[#allocation5 + $0x60] sm:$0xff]  ;;  %p1143_p9 = por %p1142_p5, %p1141_p3 }
  0x76   : > { %v295_v37 = vld [vmem:[#allocation5 + $0x68] sm:$0xff]  ;;  %v296_v38 = vld [vmem:[#allocation5 + $0x70] sm:$0xff]  ;;  %v297_v39 = vld [vmem:[#allocation5 + $0x78] sm:$0xff] }
  0x77   : > { %v459_v40 = vld [vmem:[%s1458_s28] sm:$0xff]  ;;  %v460_v1 = vld [vmem:[%s1458_s28 + $0x8] sm:$0xff]  ;;  %v461_v2 = vld [vmem:[%s1458_s28 + $0x10] sm:$0xff]  ;;  %p1144_p11 = pnand %p1143_p9, %p1137_p10 }
  0x78   : > { %908 = vmatpush3.bf16.msra.mxu0 %v905_v8  ;;  %885 = vmatprep.mubr.f32.mxu1 %v459_v40  ;;  %v462_v3 = vld [vmem:[%s1458_s28 + $0x18] sm:$0xff]  ;;  %v463_v4 = vld [vmem:[%s1458_s28 + $0x20] sm:$0xff]  ;;  %v464_v5 = vld [vmem:[%s1458_s28 + $0x28] sm:$0xff] }
  0x79   : > { %910 = vmatprep.subr.bf16.mxu0 %v909_v12  ;;  %v465_v6 = vld [vmem:[%s1458_s28 + $0x30] sm:$0xff]  ;;  %v466_v7 = vld [vmem:[%s1458_s28 + $0x38] sm:$0xff]  ;;  %v733_v8 = vld [vmem:[%s1539_s3] ss:$0 sm:$0xff] }
  0x7c   : > { %912 = vmatpush3.bf16.msra.mxu0 %v909_v12 }
  0x7d   : > { %914 = vmatprep.subr.bf16.mxu0 %v913_v15 }
  0x80   : > { %916 = vmatpush3.bf16.msra.mxu0 %v913_v15 }
  0x81   : > { %918 = vmatprep.subr.bf16.mxu0 %v917_v18 }
  0x84   : > { %920 = vmatpush3.bf16.msra.mxu0 %v917_v18 }
  0x85   : > { %922 = vmatprep.subr.bf16.mxu0 %v921_v21 }
  0x88   : > { %924 = vmatpush3.bf16.msra.mxu0 %v921_v21 }
  0x89   : > { %926 = vmatprep.subr.bf16.mxu0 %v925_v24 }
  0x8c   : > { %928 = vmatpush3.bf16.msra.mxu0 %v925_v24 }
  0x8f   : > { %830 = vmatmul.mubr.f32.vlgmr.msra.gmra.mrb[0].mxu0 %v283_v25 }
  0x90   : > { %832 = vmatprep.mubr.f32.mxu0 %v284_v26 }
  0x93   : > { %833 = vmatmul.mubr.f32.gmra.mrb[2].mxu0 %v285_v27 }
  0x94   : > { %835 = vmatprep.mubr.f32.mxu0 %v286_v28 }
  0x97   : > { %836 = vmatmul.mubr.f32.gmra.mrb[4].mxu0 %v287_v29 }
  0x98   : > { %838 = vmatprep.mubr.f32.mxu0 %v288_v30 }
  0x9b   : > { %839 = vmatmul.mubr.f32.gmra.mrb[6].mxu0 %v289_v31 }
  0x9c   : > { %841 = vmatprep.mubr.f32.mxu0 %v290_v32 }
  0x9f   : > { %842 = vmatmul.mubr.f32.gmra.mrb[8].mxu0 %v291_v33 }
  0xa0   : > { %844 = vmatprep.mubr.f32.mxu0 %v292_v34 }
  0xa3   : > { %845 = vmatmul.mubr.f32.gmra.mrb[10].mxu0 %v293_v35 }
  0xa4   : > { %847 = vmatprep.mubr.f32.mxu0 %v294_v36 }
  0xa7   : > { %848 = vmatmul.mubr.f32.gmra.mrb[12].mxu0 %v295_v37 }
  0xa8   : > { %850 = vmatprep.mubr.f32.mxu0 %v296_v38 }
  0xab   : > { %851 = vmatmul.mubr.f32.gmra.mrb[14].mxu0 %v297_v39 }
 0x162   : > { %v831_v41 = vpop.f32.mrb[0].mxu0 }
 0x163   : > { %v380_v42 = vpop.f32.mrb[1].mxu0 }
 0x164   : > { %v929_v43 = vpack.c.bf16 %v831_v41, %v380_v42 }
 0x166   : > { %v834_v44 = vpop.f32.mrb[2].mxu0  ;;  %930 = vmatprep.subr.bf16.mxu1 %v929_v43 }
 0x167   : > { %v390_v45 = vpop.f32.mrb[3].mxu0  ;;  %932 = vmatpush3.bf16.msra.mxu1 %v929_v43 }
 0x168   : > { %v933_v46 = vpack.c.bf16 %v834_v44, %v390_v45 }
 0x16a   : > { %v837_v47 = vpop.f32.mrb[4].mxu0  ;;  %934 = vmatprep.subr.bf16.mxu1 %v933_v46 }
 0x16b   : > { %v400_v48 = vpop.f32.mrb[5].mxu0  ;;  %936 = vmatpush3.bf16.msra.mxu1 %v933_v46 }
 0x16c   : > { %v937_v49 = vpack.c.bf16 %v837_v47, %v400_v48 }
 0x16e   : > { %v840_v50 = vpop.f32.mrb[6].mxu0  ;;  %938 = vmatprep.subr.bf16.mxu1 %v937_v49 }
 0x16f   : > { %v410_v51 = vpop.f32.mrb[7].mxu0  ;;  %940 = vmatpush3.bf16.msra.mxu1 %v937_v49 }
 0x170   : > { %v941_v52 = vpack.c.bf16 %v840_v50, %v410_v51 }
 0x172   : > { %v843_v53 = vpop.f32.mrb[8].mxu0  ;;  %942 = vmatprep.subr.bf16.mxu1 %v941_v52 }
 0x173   : > { %v420_v54 = vpop.f32.mrb[9].mxu0  ;;  %944 = vmatpush3.bf16.msra.mxu1 %v941_v52 }
 0x174   : > { %v945_v55 = vpack.c.bf16 %v843_v53, %v420_v54 }
 0x176   : > { %v846_v56 = vpop.f32.mrb[10].mxu0  ;;  %946 = vmatprep.subr.bf16.mxu1 %v945_v55 }
 0x177   : > { %v430_v57 = vpop.f32.mrb[11].mxu0  ;;  %948 = vmatpush3.bf16.msra.mxu1 %v945_v55 }
 0x178   : > { %v949_v58 = vpack.c.bf16 %v846_v56, %v430_v57 }
 0x17a   : > { %v849_v59 = vpop.f32.mrb[12].mxu0  ;;  %950 = vmatprep.subr.bf16.mxu1 %v949_v58 }
 0x17b   : > { %v440_v60 = vpop.f32.mrb[13].mxu0  ;;  %952 = vmatpush3.bf16.msra.mxu1 %v949_v58 }
 0x17c   : > { %v953_v61 = vpack.c.bf16 %v849_v59, %v440_v60 }
 0x17e   : > { %v852_v62 = vpop.f32.mrb[14].mxu0  ;;  %954 = vmatprep.subr.bf16.mxu1 %v953_v61 }
 0x17f   : > { %v450_v63 = vpop.f32.mrb[15].mxu0  ;;  %956 = vmatpush3.bf16.msra.mxu1 %v953_v61 }
 0x180   : > { %v957_v0 = vpack.c.bf16 %v852_v62, %v450_v63 }
 0x182   : > { %958 = vmatprep.subr.bf16.mxu1 %v957_v0 }
 0x183   : > { %960 = vmatpush3.bf16.msra.mxu1 %v957_v0 }
 0x186   : > { %886 = vmatmul.mubr.f32.vlgmr.msra.gmra.mrb[0].mxu1 %v460_v1 }
 0x187   : > { %888 = vmatprep.mubr.f32.mxu1 %v461_v2 }
 0x18a   : > { %889 = vmatmul.mubr.f32.gmra.mrb[2].mxu1 %v462_v3 }
 0x18b   : > { %891 = vmatprep.mubr.f32.mxu1 %v463_v4 }
 0x18e   : > { %892 = vmatmul.mubr.f32.gmra.mrb[4].mxu1 %v464_v5 }
 0x18f   : > { %894 = vmatprep.mubr.f32.mxu1 %v465_v6 }
 0x192   : > { %895 = vmatmul.mubr.f32.gmra.mrb[6].mxu1 %v466_v7 }
 0x259   : > { %v887_v9 = vpop.f32.mrb[0].mxu1 }
 0x25a   : > { %v546_v10 = vadd.f32 %v887_v9, %v733_v8  ;;  %v540_v11 = vpop.f32.mrb[1].mxu1 }
 0x25b   : > { %v541_v12 = vadd.f32 %v733_v8, %v540_v11 }
 0x25c   : > { %580 = vst [vmem:[%s276_s27 + $0x8] sm:$0xff] %v546_v10 }
 0x25d   : > { %579 = vst [vmem:[%s276_s27] sm:$0xff] %v541_v12  ;;  %v890_v13 = vpop.f32.mrb[2].mxu1 }
 0x25e   : > { %v556_v14 = vadd.f32 %v890_v13, %v733_v8  ;;  %v550_v15 = vpop.f32.mrb[3].mxu1 }
 0x25f   : > { %v551_v16 = vadd.f32 %v733_v8, %v550_v15 }
 0x260   : > { %582 = vst [vmem:[%s276_s27 + $0x18] sm:$0xff] %v556_v14 }
 0x261   : > { %581 = vst [vmem:[%s276_s27 + $0x10] sm:$0xff] %v551_v16  ;;  %v893_v17 = vpop.f32.mrb[4].mxu1 }
 0x262   : > { %v566_v18 = vadd.f32 %v893_v17, %v733_v8  ;;  %v560_v19 = vpop.f32.mrb[5].mxu1 }
 0x263   : > { %v561_v20 = vadd.f32 %v733_v8, %v560_v19 }
 0x264   : > { %584 = vst [vmem:[%s276_s27 + $0x28] sm:$0xff] %v566_v18 }
 0x265   : > { %583 = vst [vmem:[%s276_s27 + $0x20] sm:$0xff] %v561_v20  ;;  %v896_v21 = vpop.f32.mrb[6].mxu1 }
 0x266   : > { %v576_v22 = vadd.f32 %v896_v21, %v733_v8  ;;  %v570_v23 = vpop.f32.mrb[7].mxu1 }
 0x267   : > { %v571_v24 = vadd.f32 %v733_v8, %v570_v23 }
 0x268   : > { %586 = vst [vmem:[%s276_s27 + $0x38] sm:$0xff] %v576_v22 }
 0x269   : > { %585 = vst [vmem:[%s276_s27 + $0x30] sm:$0xff] %v571_v24 }
 0x26a   : > { %1147 = shalt.err (!%p1144_p11)
}
 0x26b   : > { %s1148_s12 = scalar_lea.hbm %s1487_s5, 1024  ;;  %s1152_s23 = scalar_lea.hbm %s1540_s4, 2048 }
 0x26c   : > { %p1149_p0 = scmp.ne.s32.totalorder %s1487_s5, %s1148_s12  ;;  %p1153_p6 = scmp.lt.u32.totalorder %s1487_s5, %s1540_s4 }
 0x26d   : > { %p1154_p7 = scmp.lt.u32.totalorder %s1152_s23, %s1148_s12  ;;  %p1156_p8 = scmp.lt.u32.totalorder %s1148_s12, %s1487_s5 }
 0x26e   : > { %p1150_p4 = pnand %p1149_p0, %p1555_p12 }
 0x26f   : > { %p1155_p2 = por %p1154_p7, %p1153_p6 }
 0x270   : > { %p1151_p13 = pneg %p1150_p4 }
 0x271   : > { %p1157_p1 = por %p1156_p8, %p1155_p2 }
 0x273   : > { %p1158_p10 = pnand %p1157_p1, %p1151_p13 }
 0x275   : > { %1161 = shalt.err (!%p1158_p10)
}
 0x276   : > { %s1228_s22 = smov 128   ;;  %s1229_s29 = smov 8  }
 0x277   : > { %971 = dma.vmem_to_hbm [thread:$0]  (%p1555_p12), %s1482_s21, 1024, %s1487_s5, %s588_s9, %s1228_s22, %s1228_s22, %s1229_s29  }
 0x278 PF: > { %s617_s14 = sand.u32 1, %s1200_s15   ;;  %p1556_p3 = scmp.ne.s32.totalorder %s1548_s26, 0 }
 0x279   : > { %p1557_p5 = scmp.ge.s32.totalorder %s1220_s20, 2  ;;  %s618_s18 = scalar_lea.sflag [#allocation4], %s617_s14 }
 0x27b   : > { %p985_p9 = pnand %p1557_p5, %p1556_p3 }
 0x27d   : > { %1195 = dma.done.wait (!%p985_p9), %s618_s18, 1024  }
 0x27e   : > { %1197 = vsyncadd (!%p985_p9), %s618_s18, 4294966272  ;;  %s21_s20 = sadd.s32 1, %s1220_s20   ;;  %s1558_s15 = smov %s1204_s16 }
 0x27f   : > { %p18_p11 = scmp.ge.s32.totalorder %s21_s20, 4   ;;  %s1559_s16 = smov %s1208_s17 }
 0x280   : > { %s1560_s17 = smov %s1403_s11  ;;  %s1561_s18 = smov %s1216_s19 }
 0x281   : > { %s1562_s19 = smov %s1564_s30  ;;  %20 = sbr.rel (!%p18_p11) target bundleno = 7 (0x7), region = 93 }
 0x288   :  { %623 = vsyncpa [#allocation3], 1 }
 0x289   :  { %625 = vsyncpa [#allocation3 + $0x1], 1 }
 0x28a   :  { %626 = vsyncpa [#allocation6], 1 }
 0x28b   :  { %627 = vsyncpa [#allocation4], 1 }
 0x28c   :  { %629 = vsyncpa [#allocation4 + $0x1], 1 }

</bundles_post_ra>
